<compile_context>
chip_gen: v6e
topology: v6e:2x2x1
jax: 0.10.0
libtpu: 0.0.40
codegen_flags: <defaults>
</compile_context>

<pallas_src>
import functools

import numpy as np
import jax
import jax.numpy as jnp
from jax.experimental import pallas as pl
from jax.experimental.pallas import tpu as pltpu


# --------------------------------------------------------------------------- #
# Pallas kernel: one block of TB output "base" rows per grid step.
# --------------------------------------------------------------------------- #
def _subpixel_conv_kernel(x_ref, w_ref, b_ref, o_ref, *, TB, W, Kp, apply_relu):
    # x_ref: (1, Hp, Wp, Cin)        halo-padded original input (one batch), bf16
    # w_ref: (Kp*Kp*Cin, s*s*Cout)   regrouped (flipped, phase-stacked) weights, bf16
    # b_ref: (1, s*s*Cout)           phase-tiled bias, f32
    # o_ref: (1, TB, W, s*s*Cout)    phase-stacked output rows for this step, f32
    ti = pl.program_id(1)
    row0 = ti * TB

    # im2col: stack the Kp*Kp shifted (TB, W, Cin) windows along the lane axis,
    # then do a single fused MXU matmul with f32 accumulation.
    pieces = []
    for dyi in range(Kp):
        for dxi in range(Kp):
            pieces.append(x_ref[0, pl.ds(row0 + dyi, TB), dxi:dxi + W, :])
    slab = jnp.concatenate(pieces, axis=-1)              # (TB, W, Kp*Kp*Cin) bf16
    slab = slab.reshape(TB * W, slab.shape[-1])          # (TB*W, Kp*Kp*Cin)

    acc = jnp.dot(slab, w_ref[...],
                  preferred_element_type=jnp.float32)    # (TB*W, s*s*Cout) f32
    acc = acc + b_ref[...]                               # (1, ssC) broadcast
    if apply_relu:
        acc = jnp.maximum(acc, 0.0)
    o_ref[0] = acc.reshape(TB, W, -1).astype(o_ref.dtype)


# --------------------------------------------------------------------------- #
# Weight regrouping (done once at init): ConvTranspose2d -> sub-pixel conv.
# --------------------------------------------------------------------------- #
def _build_subpixel_weight(w_t, s):
    """w_t: (Cin, Cout, K, K) PyTorch ConvTranspose2d weights (f32).

    Returns (w_sub bf16 of shape (Kp*Kp*Cin, s*s*Cout), Kp, halo_lo, halo_hi) with
      out[yb*s+ry, xb*s+rx, co] =
          sum_{dyi,dxi,ci} x_pad[yb+dyi, xb+dxi, ci] * w_sub[(dyi*Kp+dxi)*Cin+ci,
                                                             (ry*s+rx)*Cout+co]
    where x_pad is the input zero-padded by (halo_lo, halo_hi) on each spatial side.
    """
    w_np = np.asarray(w_t, np.float32)
    Cin, Cout, K, _ = w_np.shape
    p = (K - 1) // 2
    halo_lo = p // s
    halo_hi = (s - 1 + K - 1 - p) // s
    Kp = halo_lo + halo_hi + 1
    d_min = -halo_lo

    # Flipped ordinary-conv weights: w_flip[ky, kx, ci, co] = w[ci, co, K-1-ky, K-1-kx]
    w_flip = np.transpose(w_np[:, :, ::-1, ::-1], (2, 3, 0, 1))

    w_sub = np.zeros((Kp, Kp, Cin, s, s, Cout), np.float32)
    for dyi in range(Kp):
        for ry in range(s):
            ky = (dyi + d_min) * s + p - ry
            if not (0 <= ky < K):
                continue
            for dxi in range(Kp):
                for rx in range(s):
                    kx = (dxi + d_min) * s + p - rx
                    if not (0 <= kx < K):
                        continue
                    w_sub[dyi, dxi, :, ry, rx, :] = w_flip[ky, kx]
    w_sub = w_sub.reshape(Kp * Kp * Cin, s * s * Cout)
    return jnp.asarray(w_sub, jnp.bfloat16), Kp, halo_lo, halo_hi


def _pick_row_block(H, W, target_rows=512):
    """Largest divisor TB of H such that TB*W <= target_rows (>= 1)."""
    cap = max(1, target_rows // max(W, 1))
    tb = 1
    for d in range(1, H + 1):
        if H % d == 0 and d <= cap:
            tb = d
    return tb


# --------------------------------------------------------------------------- #
# One ConvTranspose2d (+ optional ReLU) layer.
# --------------------------------------------------------------------------- #
def conv_transpose2d_pallas(x_nhwc, layer):
    """x_nhwc: (N, H, W, Cin) f32 -> (N, H*s, W*s, Cout) f32."""
    N, H, W, Cin = x_nhwc.shape
    s, Kp, Cout = layer["s"], layer["Kp"], layer["Cout"]
    hl, hh = layer["halo_lo"], layer["halo_hi"]
    ssC = s * s * Cout

    # Glue (plain JAX): tiny halo pad of the ORIGINAL input + bf16 cast.
    xp = jnp.pad(x_nhwc.astype(jnp.bfloat16),
                 ((0, 0), (hl, hh), (hl, hh), (0, 0)))
    Hp, Wp = H + hl + hh, W + hl + hh

    TB = _pick_row_block(H, W)
    nT = H // TB

    # TODO(synk): for very large images the whole padded input stays resident per
    # batch element; a halo-tiled H BlockSpec / manual DMA would be needed to stay
    # inside v7x's 64 MiB VMEM at decoder-scale shapes.
    kernel = functools.partial(_subpixel_conv_kernel, TB=TB, W=W, Kp=Kp,
                               apply_relu=layer["apply_relu"])
    out = pl.pallas_call(
        kernel,
        out_shape=jax.ShapeDtypeStruct((N, H, W, ssC), jnp.float32),
        grid_spec=pltpu.PrefetchScalarGridSpec(
            num_scalar_prefetch=0,
            grid=(N, nT),
            in_specs=[
                pl.BlockSpec((1, Hp, Wp, Cin), lambda bi, ti: (bi, 0, 0, 0)),
                pl.BlockSpec((Kp * Kp * Cin, ssC), lambda bi, ti: (0, 0)),
                pl.BlockSpec((1, ssC), lambda bi, ti: (0, 0)),
            ],
            out_specs=pl.BlockSpec((1, TB, W, ssC),
                                   lambda bi, ti: (bi, ti, 0, 0)),
        ),
        compiler_params=pltpu.CompilerParams(
            dimension_semantics=("parallel", "parallel"),
            vmem_limit_bytes=48 * 1024 * 1024),
    )(xp, layer["w_sub"], layer["b_tiled"])

    # Depth-to-space: interleave the s*s phases back onto the spatial grid.
    out = out.reshape(N, H, W, s, s, Cout)
    out = jnp.transpose(out, (0, 1, 3, 2, 4, 5)).reshape(N, H * s, W * s, Cout)
    return out


# --------------------------------------------------------------------------- #
# Module mirror of elm.nn.conv_nn.ConvTransposeNN (activation=ReLU,
# out_activation=None, use_bias=True).
# --------------------------------------------------------------------------- #
class ConvTransposeNNPallas:

    def __init__(self, in_channels, out_channels, kernel_size, stride, key):
        self.in_channels = [in_channels] + out_channels[:-1]
        self.out_channels = out_channels
        self.num_layers = len(out_channels)
        self.kernel_size = ([kernel_size] * self.num_layers
                            if isinstance(kernel_size, int) else list(kernel_size))
        self.stride = ([stride] * self.num_layers
                       if isinstance(stride, int) else list(stride))
        self.params = []   # raw (w, b) f32, for the reference
        self.layers = []   # precomputed kernel-side constants
        for i in range(self.num_layers):
            key, wk = jax.random.split(key)
            cin, cout = self.in_channels[i], self.out_channels[i]
            k, s = self.kernel_size[i], self.stride[i]
            assert k % 2 == 1, "Currently only odd kernel size is properly handled"
            # TODO(synk): kaiming_init source not provided; use deterministic
            # kaiming-normal-like init (fan_out, relu gain, stride-rescaled).
            std = float(np.sqrt(2.0 / (cout * k * k)) / s)
            w = std * jax.random.normal(wk, (cin, cout, k, k), jnp.float32)
            b = jnp.zeros((cout,), jnp.float32)
            self.params.append((w, b))

            w_sub, Kp, hl, hh = _build_subpixel_weight(w, s)
            b_tiled = jnp.tile(b, (s * s,)).reshape(1, s * s * cout)
            self.layers.append(dict(
                w_sub=w_sub, b_tiled=b_tiled.astype(jnp.float32),
                s=s, Kp=Kp, halo_lo=hl, halo_hi=hh, Cout=cout,
                apply_relu=(i < self.num_layers - 1)))   # out_activation=None

    def __call__(self, x_nchw):
        y = jnp.transpose(x_nchw, (0, 2, 3, 1))            # NCHW -> NHWC
        for layer in self.layers:
            y = conv_transpose2d_pallas(y, layer)
        return jnp.transpose(y, (0, 3, 1, 2))              # NHWC -> NCHW


# --------------------------------------------------------------------------- #
# Pure-JAX/XLA reference (torch ConvTranspose2d semantics), bf16 inputs to match
# the kernel's MXU precision, f32 accumulation.
# --------------------------------------------------------------------------- #
def ref_forward(x_nchw, params, strides):
    y = x_nchw
    n = len(params)
    for i, (w, b) in enumerate(params):
        K = w.shape[2]
        p = (K - 1) // 2
        s = strides[i]
        op = s - 1
        w_conv = jnp.transpose(w[:, :, ::-1, ::-1], (1, 0, 2, 3)).astype(jnp.bfloat16)
        y = jax.lax.conv_general_dilated(
            y.astype(jnp.bfloat16), w_conv, window_strides=(1, 1),
            padding=((K - 1 - p, K - 1 - p + op),) * 2,
            lhs_dilation=(s, s), rhs_dilation=(1, 1),
            dimension_numbers=("NCHW", "OIHW", "NCHW"),
            preferred_element_type=jnp.float32)
        y = y + b[None, :, None, None]
        if i < n - 1:
            y = jax.nn.relu(y)
    return y


if __name__ == "__main__":
    key = jax.random.PRNGKey(0)
    key, xk, pk = jax.random.split(key, 3)

    # Small shapes: batch=2, in_channels=4, spatial=16x16; two deconv layers (s=2).
    x = jax.random.normal(xk, (2, 4, 16, 16), jnp.float32)   # NCHW like PyTorch
    model = ConvTransposeNNPallas(in_channels=4, out_channels=[8, 3],
                                  kernel_size=3, stride=2, key=pk)

    out = model(x)
    out = jax.block_until_ready(out)
    assert out.shape == (2, 3, 64, 64), out.shape            # spatial *= stride/layer

    expected = ref_forward(x, model.params, model.stride)
    np.testing.assert_allclose(np.asarray(out), np.asarray(expected),
                               atol=2e-3, rtol=2e-3)
    print("KERNEL_OK")
</pallas_src>

<mosaic_0001>
module attributes {stable_mosaic.version = 11 : i64} {
  func.func @_subpixel_conv_kernel(%arg0: i32, %arg1: i32, %arg2: memref<1x17x17x4xbf16, #tpu.memory_space<vmem>>, %arg3: memref<16x32xbf16, #tpu.memory_space<vmem>>, %arg4: memref<1x32xf32, #tpu.memory_space<vmem>>, %arg5: memref<1x16x16x32xf32, #tpu.memory_space<vmem>>) attributes {dimension_semantics = [#tpu.dimension_semantics<parallel>, #tpu.dimension_semantics<parallel>], iteration_bounds = array<i64: 2, 1>, scalar_prefetch = 0 : i64, scratch_operands = 0 : i64, tpu.core_type = #tpu.core_type<tc>, window_params = [{transform_indices = @transform_0, window_bounds = array<i64: 1, 17, 17, 4>}, {pipeline_mode = #tpu.pipeline_mode<synchronous>, transform_indices = @transform_1, window_bounds = array<i64: 16, 32>}, {pipeline_mode = #tpu.pipeline_mode<synchronous>, transform_indices = @transform_2, window_bounds = array<i64: 1, 32>}, {transform_indices = @transform_3, window_bounds = array<i64: 1, 16, 16, 32>}]} {
    %c16_i32 = arith.constant 16 : i32
    %0 = arith.muli %arg1, %c16_i32 : i32
    %c0_i32 = arith.constant 0 : i32
    %1 = arith.addi %0, %c0_i32 : i32
    %c0 = arith.constant 0 : index
    %2 = arith.index_cast %1 : i32 to index
    %c0_0 = arith.constant 0 : index
    %c0_1 = arith.constant 0 : index
    %3 = vector.load %arg2[%c0, %2, %c0_0, %c0_1] : memref<1x17x17x4xbf16, #tpu.memory_space<vmem>>, vector<1x16x16x4xbf16>
    %4 = vector.shape_cast %3 : vector<1x16x16x4xbf16> to vector<16x16x4xbf16>
    %c0_i32_2 = arith.constant 0 : i32
    %5 = arith.addi %0, %c0_i32_2 : i32
    %c0_3 = arith.constant 0 : index
    %6 = arith.index_cast %5 : i32 to index
    %c1 = arith.constant 1 : index
    %c0_4 = arith.constant 0 : index
    %7 = vector.load %arg2[%c0_3, %6, %c1, %c0_4] : memref<1x17x17x4xbf16, #tpu.memory_space<vmem>>, vector<1x16x16x4xbf16>
    %8 = vector.shape_cast %7 : vector<1x16x16x4xbf16> to vector<16x16x4xbf16>
    %c1_i32 = arith.constant 1 : i32
    %9 = arith.addi %0, %c1_i32 : i32
    %c0_5 = arith.constant 0 : index
    %10 = arith.index_cast %9 : i32 to index
    %c0_6 = arith.constant 0 : index
    %c0_7 = arith.constant 0 : index
    %11 = vector.load %arg2[%c0_5, %10, %c0_6, %c0_7] : memref<1x17x17x4xbf16, #tpu.memory_space<vmem>>, vector<1x16x16x4xbf16>
    %12 = vector.shape_cast %11 : vector<1x16x16x4xbf16> to vector<16x16x4xbf16>
    %c1_i32_8 = arith.constant 1 : i32
    %13 = arith.addi %0, %c1_i32_8 : i32
    %c0_9 = arith.constant 0 : index
    %14 = arith.index_cast %13 : i32 to index
    %c1_10 = arith.constant 1 : index
    %c0_11 = arith.constant 0 : index
    %15 = vector.load %arg2[%c0_9, %14, %c1_10, %c0_11] : memref<1x17x17x4xbf16, #tpu.memory_space<vmem>>, vector<1x16x16x4xbf16>
    %16 = vector.shape_cast %15 : vector<1x16x16x4xbf16> to vector<16x16x4xbf16>
    %17 = tpu.concatenate %4, %8, %12, %16 in 2 : vector<16x16x4xbf16>, vector<16x16x4xbf16>, vector<16x16x4xbf16>, vector<16x16x4xbf16> -> vector<16x16x16xbf16>
    %18 = vector.shape_cast %17 : vector<16x16x16xbf16> to vector<256x16xbf16>
    %c0_12 = arith.constant 0 : index
    %c0_13 = arith.constant 0 : index
    %19 = vector.load %arg3[%c0_12, %c0_13] : memref<16x32xbf16, #tpu.memory_space<vmem>>, vector<16x32xbf16>
    %cst = arith.constant dense<0.000000e+00> : vector<256x32xf32>
    %20 = tpu.matmul %18, %19, %cst {dimension_numbers = #tpu.dot_dimension_numbers<[1], [0], [0], [1], [0, 0, 1, 1], [], []>} : vector<256x16xbf16>, vector<16x32xbf16>, vector<256x32xf32> -> vector<256x32xf32>
    %c0_14 = arith.constant 0 : index
    %c0_15 = arith.constant 0 : index
    %21 = vector.load %arg4[%c0_14, %c0_15] : memref<1x32xf32, #tpu.memory_space<vmem>>, vector<1x32xf32>
    %22 = vector.broadcast %21 : vector<1x32xf32> to vector<256x32xf32>
    %23 = arith.addf %20, %22 : vector<256x32xf32>
    %cst_16 = arith.constant 0.000000e+00 : f32
    %24 = vector.broadcast %cst_16 : f32 to vector<256x32xf32>
    %25 = arith.maximumf %23, %24 : vector<256x32xf32>
    %26 = vector.shape_cast %25 : vector<256x32xf32> to vector<16x16x32xf32>
    %c0_17 = arith.constant 0 : index
    %c0_18 = arith.constant 0 : index
    %c0_19 = arith.constant 0 : index
    %c0_20 = arith.constant 0 : index
    %27 = vector.load %arg5[%c0_17, %c0_18, %c0_19, %c0_20] : memref<1x16x16x32xf32, #tpu.memory_space<vmem>>, vector<1x16x16x32xf32>
    %28 = vector.shape_cast %27 : vector<1x16x16x32xf32> to vector<16x16x32xf32>
    %29 = vector.shape_cast %26 : vector<16x16x32xf32> to vector<1x16x16x32xf32>
    tpu.vector_store %arg5[%c0_17, %c0_18, %c0_19, %c0_20], %29 {strides = array<i32>} : memref<1x16x16x32xf32, #tpu.memory_space<vmem>>, vector<1x16x16x32xf32>,
    return
  }
  func.func @transform_0(%arg0: i32, %arg1: i32) -> (i32, i32, i32, i32) {
    %c0_i32 = arith.constant 0 : i32
    %c0_i32_0 = arith.constant 0 : i32
    %c0_i32_1 = arith.constant 0 : i32
    %c0_i32_2 = arith.constant 0 : i32
    return %arg0, %c0_i32, %c0_i32_0, %c0_i32_1 : i32, i32, i32, i32
  }
  func.func @transform_1(%arg0: i32, %arg1: i32) -> (i32, i32) {
    %c0_i32 = arith.constant 0 : i32
    %c0_i32_0 = arith.constant 0 : i32
    %c0_i32_1 = arith.constant 0 : i32
    return %c0_i32, %c0_i32_0 : i32, i32
  }
  func.func @transform_2(%arg0: i32, %arg1: i32) -> (i32, i32) {
    %c0_i32 = arith.constant 0 : i32
    %c0_i32_0 = arith.constant 0 : i32
    %c0_i32_1 = arith.constant 0 : i32
    return %c0_i32, %c0_i32_0 : i32, i32
  }
  func.func @transform_3(%arg0: i32, %arg1: i32) -> (i32, i32, i32, i32) {
    %c0_i32 = arith.constant 0 : i32
    %c0_i32_0 = arith.constant 0 : i32
    %c0_i32_1 = arith.constant 0 : i32
    return %arg0, %arg1, %c0_i32, %c0_i32_0 : i32, i32, i32, i32
  }
}

</mosaic_0001>

<bundles_post_ra>
// kernel: tpu_custom_call.1
= control target key start
LH: loop header
LB: loop body
LE: loop exit
PB: predicated region body
PF: predicated region fallthrough
CT: control target
= control target key end

     0   :  { %8 = vsyncpa [#allocation3], 0  ;;  %s2450_s0 = inlined_call_operand.vmem [shape: bf16[2,17,17,4], index: 0, kind: input, shape index: {}]   ;;  %s2451_s1 = inlined_call_operand.vmem [shape: bf16[16,32], index: 1, kind: input, shape index: {}]   ;;  %s2452_s2 = inlined_call_operand.vmem [shape: f32[1,32], index: 2, kind: input, shape index: {}]   ;;  %s2453_s3 = inlined_call_operand.hbm [shape: f32[2,16,16,32], index: 3, kind: output, shape index: {}]  }
   0x1   :  { %10 = vsyncpa [#allocation3 + $0x1], 0  ;;  %s1919_s12 = smov 0   ;;  %s1921_s13 = smov 0  }
   0x2   :  { %s1923_s14 = smov 0   ;;  %s1925_s15 = smov 0  }
   0x3   :  { %s1927_s16 = smov 0   ;;  %s1929_s17 = smov 0  }
   0x4 LB: > { %s1495_s18 = sadd.s32 4294967295, %s1892_s17   ;;  %s1496_s19 = sadd.s32 4294967294, %s1892_s17   ;;  %s1892_s17 = sphi %s1929_s17, %s16_s17   ;;  %s1888_s16 = sphi %s1927_s16, %s2460_s16   ;;  %s1884_s15 = sphi %s1925_s15, %s2459_s15   ;;  %s1880_s14 = sphi %s1923_s14, %s2458_s14   ;;  %s1876_s13 = sphi %s1921_s13, %s2457_s13   ;;  %s1872_s12 = sphi %s1919_s12, %s2456_s12  }
   0x5   : > { %s28_s20 = sadd.s32 1, %s1888_s16  ;;  %s105_s21 = sadd.s32 1, %s1880_s14 }
   0x6   : > { %p30_p0 = scmp.ge.s32.totalorder %s28_s20, 2  ;;  %p115_p1 = scmp.ne.s32.totalorder %s1880_s14, %s1876_s13 }
   0x7   : > { %p116_p2 = scmp.eq.s32.totalorder %s1495_s18, 1  ;;  %p121_p3 = scmp.ne.s32.totalorder %s1876_s13, %s1872_s12 }
   0x8   : > { %s2462_s20 = smov (%p30_p0, %s28_s20), 0  ;;  %p122_p5 = scmp.eq.s32.totalorder %s1496_s19, 1 }
   0x9   : > { %p1959_p4 = por %p116_p2, %p115_p1  ;;  %s100_s23 = ssub.s32 %s1888_s16, %s2462_s20 }
   0xa   : > { %p1499_p6 = scmp.ge.s32.totalorder %s1892_s17, 1  ;;  %p103_p7 = scmp.eq.s32.totalorder %s100_s23, 0 }
   0xb   : > { %p1966_p8 = por %p122_p5, %p121_p3  ;;  %p154_p9 = scmp.lt.s32.totalorder %s1892_s17, 3 }
   0xc   : > { %s1972_s25 = scalar_select %p103_p7, %s1880_s14, %s105_s21  }
   0xd   : > { %p155_p10 = pnand %p1499_p6, %p154_p9 }
   0xe   : > { %p178_p11 = scmp.lt.s32.totalorder (!%p155_p10), %s1884_s15, 1  ;;  %s1894_s4 = smov (!%p155_p10), 8  }
   0xf   : > { %158 = sbr.rel (%p155_p10) target bundleno = 453 (0x1c5), region = 32  ;;  %s1895_s5 = smov (!%p155_p10), 4  }
  0x10   : > { %s1896_s6 = smov (!%p155_p10), 12   ;;  %s175_s9 = sand.u32 (!%p155_p10), 1, %s1876_s13  }
  0x11   : > { %s1500_s18 = sshll.u32 (!%p155_p10), %s175_s9, 8  ;;  %s1637_s21 = sshll.u32 (!%p155_p10), %s1884_s15, 12 }
  0x12   : > { %s2298_s19 = scalar_lea.vmem (!%p155_p10), [#allocation2], %s1500_s18  ;;  %s2392_s28 = scalar_lea.hbm (!%p155_p10), %s2453_s3, %s1637_s21 }
  0x13   : > { %s1416_s23 = sshll.u32 (!%p155_p10), %s2298_s19, 4  ;;  %s2398_s23 = int_to_ptr.vmem [resolvable:$true] %s1416_s23 }
  0x14   : > { %s179_s26 = scalar_select %p178_p11, %s1884_s15, 1  ;;  %vm417_vm0 = vsmask.f32 7424  ;;  %vm1026_vm1 = vcmask 31744   ;;  %vm1092_vm2 = vcmask 97280   ;;  %vm1059_vm3 = vcmask 64512  }
  0x15   : > { %vm1140_vm4 = vcmask 130048   ;;  %vm1366_vm5 = vcmask 261120   ;;  %s2404_s15 = scalar_lea.sflag [#allocation3], %s175_s9  ;;  %s1816_s29 = scalar_lea.vmem %s2398_s23, 4096 }
  0x16   : > { %s1691_s27 = smul.u32 204, %s179_s26  ;;  %p1817_p12 = scmp.ne.s32.totalorder %s2398_s23, %s1816_s29 }
  0x18   : > { %s1979_s30 = scalar_lea.vmem %s2450_s0, %s1691_s27  ;;  %p1818_p13 = pnand %p1817_p12, %p1959_p4 }
  0x19   : > { %v1751_v0 = vld [vmem:[%s1979_s30 + $0x6c] sm:$0xff]   ;;  %v1987_v3 = vld [vmem:[%s1979_s30 + $0x78] sm:$0xff]   ;;  %v1756_v9 = vld [vmem:[%s1979_s30 + $0x14] ss:$0 sps:$4 sm:$0x11]  }
  0x1a   : > { %v1983_v1 = vld [vmem:[%s1979_s30 + $0xc] sm:$0xff]   ;;  %738 = vrot.lane.b32.xlu1 %v1751_v0, %s1894_s4  ;;  %v901_v2 = vshll.u32 %v1751_v0, 16  ;;  %v1993_v5 = vld [vmem:[%s1979_s30 + $0x18] sm:$0xff]   ;;  %v913_v6 = vshll.u32 %v1987_v3, 16  ;;  %v438_v12 = vshll.u32 %v1756_v9, 16  ;;  %v2008_v13 = vld [vmem:[%s1979_s30] sm:$0xff]   ;;  %p1819_p0 = pneg %p1818_p13 }
  0x1b   : > { %722 = vrot.lane.b32.xlu0 %v1983_v1, %s1894_s4  ;;  %v805_v4 = vshll.u32 %v1983_v1, 16  ;;  %v1997_v7 = vld [vmem:[%s1979_s30 + $0xc] sm:$0xff]   ;;  %v817_v8 = vshll.u32 %v1993_v5, 16  ;;  %v1758_v15 = vld [vmem:[%s1979_s30 + $0x8] ss:$0 sps:$4 sm:$0x11]  }
  0x1c   : > { %v431_v10 = vshrl.u32 %v1997_v7, 16  ;;  %v433_v11 = vshll.u32 %v1997_v7, 16  ;;  %v440_v16 = vrot.slane %v438_v12, 1  ;;  %v419_v17 = vshrl.u32 %v2008_v13, 16  ;;  %v2014_v19 = vld [vmem:[%s1979_s30 + $0x6c] sm:$0xff]   ;;  %v2020_v26 = vld [vmem:[%s1979_s30 + $0x60] sm:$0xff]  }
  0x1d   : > { %v421_v18 = vshll.u32 %v2008_v13, 16  ;;  %v426_v21 = vshll.u32 %v1758_v15, 16  ;;  %v1760_v22 = vld [vmem:[%s1979_s30 + $0x74] ss:$0 sps:$4 sm:$0x11]   ;;  %v527_v24 = vshrl.u32 %v2014_v19, 16 }
  0x1e   : > { %740 = vrot.lane.b32.xlu1 %v1987_v3, %s1894_s4  ;;  %v435_v14 = vrot.slane %v433_v11, 1  ;;  %v529_v25 = vshll.u32 %v2014_v19, 16  ;;  %v534_v29 = vshll.u32 %v1760_v22, 16  ;;  %v1762_v32 = vld [vmem:[%s1979_s30 + $0x68] ss:$0 sps:$4 sm:$0x11]  }
  0x1f   : > { %724 = vrot.lane.b32.xlu0 %v1993_v5, %s1894_s4  ;;  %v423_v23 = vrot.slane %v421_v18, 1  ;;  %v428_v28 = vrot.slane %v426_v21, 1  ;;  %v515_v33 = vshrl.u32 %v2020_v26, 16  ;;  %v517_v34 = vshll.u32 %v2020_v26, 16  ;;  %v2036_v53 = vld [vmem:[%s1979_s30 + $0x78] sm:$0xff]   ;;  %v2050_v11 = vld [vmem:[%s1979_s30 + $0x84] sm:$0xff]  }
  0x20   : > { %v436_v20 = vor.u32 %v435_v14, %v431_v10  ;;  %v531_v31 = vrot.slane %v529_v25, 1  ;;  %v536_v35 = vrot.slane %v534_v29, 1  ;;  %v1763_v36 = vld [vmem:[%s1979_s30 + $0x74] ss:$0 sps:$4 sm:$0x11]   ;;  %v899_v37 = vshrl.u32 %v1751_v0, 16 }
  0x21   : > { %v424_v30 = vor.u32 %v423_v23, %v419_v17  ;;  %v903_v38 = vrot.slane %v901_v2, 1  ;;  %v519_v41 = vrot.slane %v517_v34, 1  ;;  %v522_v42 = vshll.u32 %v1762_v32, 16  ;;  %v1764_v45 = vld [vmem:[%s1979_s30 + $0x14] ss:$0 sps:$4 sm:$0x11]  }
  0x22   : > { %v441_v27 = vsel %vm417_vm0, %v436_v20, %v440_v16  ;;  %v532_v40 = vor.u32 %v531_v31, %v527_v24  ;;  %v906_v44 = vshll.u32 %v1763_v36, 16  ;;  %v803_v46 = vshrl.u32 %v1983_v1, 16  ;;  %v1765_v51 = vld [vmem:[%s1979_s30 + $0x80] ss:$0 sps:$4 sm:$0x11]   ;;  %v2040_v58 = vld [vmem:[%s1979_s30 + $0x18] sm:$0xff]  }
  0x23   : > { %612 = vrot.lane.b32.xlu1 %v441_v27, %s1895_s5  ;;  %v429_v39 = vsel %vm417_vm0, %v424_v30, %v428_v28  ;;  %v904_v43 = vor.u32 %v903_v38, %v899_v37  ;;  %v807_v47 = vrot.slane %v805_v4, 1  ;;  %v520_v49 = vor.u32 %v519_v41, %v515_v33  ;;  %v1766_v61 = vld [vmem:[%s1979_s30 + $0x20] ss:$0 sps:$4 sm:$0x11]   ;;  %v2066_v30 = vld [vmem:[%s1979_s30 + $0x24] sm:$0xff]  }
  0x24   : > { %610 = vrot.lane.b32.xlu0 %v429_v39, %s1895_s5  ;;  %v537_v48 = vsel %vm417_vm0, %v532_v40, %v536_v35  ;;  %v524_v50 = vrot.slane %v522_v42, 1  ;;  %v911_v52 = vshrl.u32 %v1987_v3, 16  ;;  %v908_v54 = vrot.slane %v906_v44, 1  ;;  %v1770_v18 = vld [vmem:[%s1979_s30 + $0x20] ss:$0 sps:$4 sm:$0x11]  }
  0x25   : > { %v808_v55 = vor.u32 %v807_v47, %v803_v46  ;;  %v810_v56 = vshll.u32 %v1764_v45, 16  ;;  %v915_v57 = vrot.slane %v913_v6, 1  ;;  %v918_v60 = vshll.u32 %v1765_v51, 16  ;;  %v1772_v28 = vld [vmem:[%s1979_s30 + $0x8c] ss:$0 sps:$4 sm:$0x11]  }
  0x26   : > { %v525_v59 = vsel %vm417_vm0, %v520_v49, %v524_v50  ;;  %v815_v62 = vshrl.u32 %v1993_v5, 16  ;;  %v819_v63 = vrot.slane %v817_v8, 1  ;;  %v909_v0 = vsel %vm417_vm0, %v904_v43, %v908_v54  ;;  %v1768_v8 = vld [vmem:[%s1979_s30 + $0x80] ss:$0 sps:$4 sm:$0x11]   ;;  %v1775_v41 = vld [vmem:[%s1979_s30 + $0x84] sm:$0xff]  }
  0x27   : > { %628 = vrot.lane.b32.xlu1 %v537_v48, %s1895_s5  ;;  %v812_v1 = vrot.slane %v810_v56, 1  ;;  %v916_v2 = vor.u32 %v915_v57, %v911_v52  ;;  %v539_v3 = vshrl.u32 %v2036_v53, 16  ;;  %v920_v4 = vrot.slane %v918_v60, 1  ;;  %v1774_v36 = vld [vmem:[%s1979_s30 + $0x2c] ss:$0 sps:$4 sm:$0x11]  }
  0x28   : > { %626 = vrot.lane.b32.xlu0 %v525_v59, %s1895_s5  ;;  %v820_v6 = vor.u32 %v819_v63, %v815_v62  ;;  %v822_v9 = vshll.u32 %v1766_v61, 16  ;;  %v541_v10 = vshll.u32 %v2036_v53, 16  ;;  %v443_v12 = vshrl.u32 %v2040_v58, 16  ;;  %v1776_v45 = vld [vmem:[%s1979_s30 + $0x24] sm:$0xff]   ;;  %v1777_v46 = vld [vmem:[%s1979_s30 + $0x90] sm:$0xff]  }
  0x29   : > { %v813_v5 = vsel %vm417_vm0, %v808_v55, %v812_v1  ;;  %v921_v14 = vsel %vm417_vm0, %v916_v2, %v920_v4  ;;  %v546_v17 = vshll.u32 %v1768_v8, 16  ;;  %v445_v20 = vshll.u32 %v2040_v58, 16  ;;  %v1778_v48 = vld [vmem:[%s1979_s30 + $0x30] sm:$0xff]   ;;  %v1779_v60 = vld [vmem:[%s1979_s30 + $0x8c] ss:$0 sps:$4 sm:$0x11]  }
  0x2a   : > { %v824_v15 = vrot.slane %v822_v9, 1  ;;  %v543_v16 = vrot.slane %v541_v10, 1  ;;  %v551_v21 = vshrl.u32 %v2050_v11, 16  ;;  %v450_v27 = vshll.u32 %v1770_v18, 16 }
  0x2b   : > { %1010 = vrot.lane.b32.xlu1 %v909_v0, %s1896_s6  ;;  %v548_v24 = vrot.slane %v546_v17, 1  ;;  %v447_v25 = vrot.slane %v445_v20, 1  ;;  %v553_v29 = vshll.u32 %v2050_v11, 16  ;;  %v558_v34 = vshll.u32 %v1772_v28, 16  ;;  %v2094_v17 = vld [vmem:[%s1979_s30 + $0x30] sm:$0xff]  }
  0x2c   : > { %994 = vrot.lane.b32.xlu0 %v813_v5, %s1896_s6  ;;  %v825_v22 = vsel %vm417_vm0, %v820_v6, %v824_v15  ;;  %v544_v23 = vor.u32 %v543_v16, %v539_v3  ;;  %v452_v33 = vrot.slane %v450_v27, 1  ;;  %v455_v37 = vshrl.u32 %v2066_v30, 16  ;;  %v1780_v62 = vld [vmem:[%s1979_s30 + $0x2c] ss:$0 sps:$4 sm:$0x11]  }
  0x2d   : > { %v448_v32 = vor.u32 %v447_v25, %v443_v12  ;;  %v555_v35 = vrot.slane %v553_v29, 1  ;;  %v457_v38 = vshll.u32 %v2066_v30, 16  ;;  %v560_v40 = vrot.slane %v558_v34, 1  ;;  %v1781_v1 = vld [vmem:[%s1979_s30 + $0x98] ss:$0 sps:$4 sm:$0x11]  }
  0x2e   : > { %v549_v31 = vsel %vm417_vm0, %v544_v23, %v548_v24  ;;  %v462_v44 = vshll.u32 %v1774_v36, 16  ;;  %v925_v47 = vshll.u32 %v1775_v41, 16  ;;  %v829_v52 = vshll.u32 %v1776_v45, 16  ;;  %v1782_v6 = vld [vmem:[%s1979_s30 + $0x38] ss:$0 sps:$4 sm:$0x11]  }
  0x2f   : > { %1012 = vrot.lane.b32.xlu1 %v921_v14, %s1896_s6  ;;  %v453_v39 = vsel %vm417_vm0, %v448_v32, %v452_v33  ;;  %v556_v42 = vor.u32 %v555_v35, %v551_v21  ;;  %v459_v43 = vrot.slane %v457_v38, 1  ;;  %v937_v54 = vshll.u32 %v1777_v46, 16  ;;  %v2090_v12 = vld [vmem:[%s1979_s30 + $0x90] sm:$0xff]   ;;  %v1784_v21 = vld [vmem:[%s1979_s30 + $0x98] ss:$0 sps:$4 sm:$0x11]  }
  0x30   : > { %996 = vrot.lane.b32.xlu0 %v825_v22, %s1896_s6  ;;  %v464_v51 = vrot.slane %v462_v44, 1  ;;  %v841_v55 = vshll.u32 %v1778_v48, 16  ;;  %v923_v56 = vshrl.u32 %v1775_v41, 16  ;;  %v927_v57 = vrot.slane %v925_v47, 1 }
  0x31   : > { %v561_v49 = vsel %vm417_vm0, %v556_v42, %v560_v40  ;;  %v460_v50 = vor.u32 %v459_v43, %v455_v37  ;;  %v827_v61 = vshrl.u32 %v1776_v45, 16  ;;  %v831_v63 = vrot.slane %v829_v52, 1  ;;  %v1786_v33 = vld [vmem:[%s1979_s30 + $0x38] ss:$0 sps:$4 sm:$0x11]  }
  0x32   : > { %v930_v0 = vshll.u32 %v1779_v60, 16  ;;  %v935_v2 = vshrl.u32 %v1777_v46, 16  ;;  %v939_v3 = vrot.slane %v937_v54, 1  ;;  %v834_v4 = vshll.u32 %v1780_v62, 16  ;;  %v1792_v62 = vld [vmem:[%s1979_s30 + $0x3c] sm:$0xff]  }
  0x33   : > { %630 = vrot.lane.b32.xlu1 %v549_v31, %s1895_s5  ;;  %v465_v59 = vsel %vm417_vm0, %v460_v50, %v464_v51  ;;  %v928_v9 = vor.u32 %v927_v57, %v923_v56  ;;  %v942_v5 = vshll.u32 %v1781_v1, 16  ;;  %v839_v8 = vshrl.u32 %v1778_v48, 16  ;;  %v2103_v31 = vld [vmem:[%s1979_s30 + $0x9c] sm:$0xff]   ;;  %v1788_v40 = vld [vmem:[%s1979_s30 + $0xa4] ss:$0 sps:$4 sm:$0x11]  }
  0x34   : > { %614 = vrot.lane.b32.xlu0 %v453_v39, %s1895_s5  ;;  %v932_v10 = vrot.slane %v930_v0, 1  ;;  %v836_v14 = vrot.slane %v834_v4, 1  ;;  %v843_v15 = vrot.slane %v841_v55, 1  ;;  %v846_v16 = vshll.u32 %v1782_v6, 16  ;;  %v1791_v56 = vld [vmem:[%s1979_s30 + $0x9c] sm:$0xff]  }
  0x35   : > { %v832_v18 = vor.u32 %v831_v63, %v827_v61  ;;  %v944_v20 = vrot.slane %v942_v5, 1  ;;  %v940_v22 = vor.u32 %v939_v3, %v935_v2  ;;  %v563_v24 = vshrl.u32 %v2090_v12, 16  ;;  %v1790_v51 = vld [vmem:[%s1979_s30 + $0x44] ss:$0 sps:$4 sm:$0x11]   ;;  %v1793_v63 = vld [vmem:[%s1979_s30 + $0xa8] sm:$0xff]  }
  0x36   : > { %v848_v23 = vrot.slane %v846_v16, 1  ;;  %v933_v25 = vsel %vm417_vm0, %v928_v9, %v932_v10  ;;  %v565_v27 = vshll.u32 %v2090_v12, 16  ;;  %v570_v28 = vshll.u32 %v1784_v21, 16  ;;  %v1794_v3 = vld [vmem:[%s1979_s30 + $0x48] sm:$0xff]  }
  0x37   : > { %632 = vrot.lane.b32.xlu1 %v561_v49, %s1895_s5  ;;  %v467_v29 = vshrl.u32 %v2094_v17, 16  ;;  %v844_v32 = vor.u32 %v843_v15, %v839_v8  ;;  %v469_v34 = vshll.u32 %v2094_v17, 16  ;;  %v837_v35 = vsel %vm417_vm0, %v832_v18, %v836_v14  ;;  %v1795_v5 = vld [vmem:[%s1979_s30 + $0xa4] ss:$0 sps:$4 sm:$0x11]  }
  0x38   : > { %616 = vrot.lane.b32.xlu0 %v465_v59, %s1895_s5  ;;  %v567_v36 = vrot.slane %v565_v27, 1  ;;  %v572_v37 = vrot.slane %v570_v28, 1  ;;  %v474_v39 = vshll.u32 %v1786_v33, 16  ;;  %v945_v42 = vsel %vm417_vm0, %v940_v22, %v944_v20  ;;  %v1796_v8 = vld [vmem:[%s1979_s30 + $0x44] ss:$0 sps:$4 sm:$0x11]  }
  0x39   : > { %v471_v38 = vrot.slane %v469_v34, 1  ;;  %v577_v44 = vshll.u32 %v2103_v31, 16  ;;  %v486_v61 = vshll.u32 %v1790_v51, 16  ;;  %v949_v4 = vshll.u32 %v1791_v56, 16  ;;  %v2139_v28 = vld [vmem:[%s1979_s30 + $0xa8] sm:$0xff]  }
  0x3a   : > { %v568_v43 = vor.u32 %v567_v36, %v563_v24  ;;  %v476_v47 = vrot.slane %v474_v39, 1  ;;  %v853_v6 = vshll.u32 %v1792_v62, 16  ;;  %v961_v10 = vshll.u32 %v1793_v63, 16  ;;  %v1797_v18 = vld [vmem:[%s1979_s30 + $0xb0] ss:$0 sps:$4 sm:$0x11]  }
  0x3b   : > { %742 = vrot.lane.b32.xlu1 %v1775_v41, %s1894_s4  ;;  %v575_v41 = vshrl.u32 %v2103_v31, 16  ;;  %v472_v49 = vor.u32 %v471_v38, %v467_v29  ;;  %v579_v50 = vrot.slane %v577_v44, 1  ;;  %v488_v2 = vrot.slane %v486_v61, 1  ;;  %v1800_v33 = vld [vmem:[%s1979_s30 + $0xb0] ss:$0 sps:$4 sm:$0x11]  }
  0x3c   : > { %726 = vrot.lane.b32.xlu0 %v1776_v45, %s1894_s4  ;;  %v2115_v45 = vld [vmem:[%s1979_s30 + $0x3c] sm:$0xff]   ;;  %v573_v57 = vsel %vm417_vm0, %v568_v43, %v572_v37  ;;  %v865_v15 = vshll.u32 %v1794_v3, 16  ;;  %v947_v16 = vshrl.u32 %v1791_v56, 16  ;;  %v951_v20 = vrot.slane %v949_v4, 1  ;;  %v2145_v34 = vld [vmem:[%s1979_s30 + $0x48] sm:$0xff]  }
  0x3d   : > { %v479_v52 = vshrl.u32 %v2115_v45, 16  ;;  %v481_v54 = vshll.u32 %v2115_v45, 16  ;;  %v580_v59 = vor.u32 %v579_v50, %v575_v41  ;;  %v477_v0 = vsel %vm417_vm0, %v472_v49, %v476_v47  ;;  %v2150_v41 = vld [vmem:[%s1979_s30 + $0xb4] sm:$0xff]   ;;  %v1802_v44 = vld [vmem:[%s1979_s30 + $0x50] ss:$0 sps:$4 sm:$0x11]  }
  0x3e   : > { %v954_v21 = vshll.u32 %v1795_v5, 16  ;;  %v851_v22 = vshrl.u32 %v1792_v62, 16  ;;  %v858_v24 = vshll.u32 %v1796_v8, 16  ;;  %v963_v27 = vrot.slane %v961_v10, 1 }
  0x3f   : > { %744 = vrot.lane.b32.xlu1 %v1777_v46, %s1894_s4  ;;  %v849_v46 = vsel %vm417_vm0, %v844_v32, %v848_v23  ;;  %v483_v60 = vrot.slane %v481_v54, 1  ;;  %v855_v23 = vrot.slane %v853_v6, 1  ;;  %v966_v29 = vshll.u32 %v1797_v18, 16  ;;  %v1798_v32 = vld [vmem:[%s1979_s30 + $0x50] ss:$0 sps:$4 sm:$0x11]  }
  0x40   : > { %728 = vrot.lane.b32.xlu0 %v1778_v48, %s1894_s4  ;;  %v582_v48 = vshll.u32 %v1788_v40, 16  ;;  %v863_v36 = vshrl.u32 %v1794_v3, 16  ;;  %v952_v37 = vor.u32 %v951_v20, %v947_v16  ;;  %v860_v38 = vrot.slane %v858_v24, 1  ;;  %v1807_v20 = vld [vmem:[%s1979_s30 + $0xb4] sm:$0xff]  }
  0x41   : > { %v484_v1 = vor.u32 %v483_v60, %v479_v52  ;;  %v867_v39 = vrot.slane %v865_v15, 1  ;;  %v589_v40 = vshll.u32 %v2139_v28, 16  ;;  %v870_v43 = vshll.u32 %v1798_v32, 16  ;;  %v1804_v52 = vld [vmem:[%s1979_s30 + $0xbc] ss:$0 sps:$4 sm:$0x11]  }
  0x42   : > { %v584_v55 = vrot.slane %v582_v48, 1  ;;  %v493_v47 = vshll.u32 %v2145_v34, 16  ;;  %v587_v49 = vshrl.u32 %v2139_v28, 16  ;;  %v594_v51 = vshll.u32 %v1800_v33, 16  ;;  %v1808_v24 = vld [vmem:[%s1979_s30 + $0x54] sm:$0xff]  }
  0x43   : > { %1014 = vrot.lane.b32.xlu1 %v933_v25, %s1896_s6  ;;  %v489_v14 = vsel %vm417_vm0, %v484_v1, %v488_v2  ;;  %v959_v25 = vshrl.u32 %v1793_v63, 16  ;;  %v591_v50 = vrot.slane %v589_v40, 1  ;;  %v498_v60 = vshll.u32 %v1802_v44, 16  ;;  %v1810_v40 = vld [vmem:[%s1979_s30 + $0x60] sm:$0xff]  }
  0x44   : > { %998 = vrot.lane.b32.xlu0 %v837_v35, %s1896_s6  ;;  %v585_v9 = vsel %vm417_vm0, %v580_v59, %v584_v55  ;;  %v956_v35 = vrot.slane %v954_v21, 1  ;;  %v601_v55 = vshll.u32 %v2150_v41, 16  ;;  %v872_v59 = vrot.slane %v870_v43, 1 }
  0x45   : > { %v964_v48 = vor.u32 %v963_v27, %v959_v25  ;;  %v868_v61 = vor.u32 %v867_v39, %v863_v36  ;;  %v596_v4 = vrot.slane %v594_v51, 1  ;;  %v592_v6 = vor.u32 %v591_v50, %v587_v49  ;;  %v1811_v36 = vld [vmem:[%s1979_s30 + $0xbc] ss:$0 sps:$4 sm:$0x11]  }
  0x46   : > { %v957_v54 = vsel %vm417_vm0, %v952_v37, %v956_v35  ;;  %v606_v10 = vshll.u32 %v1804_v52, 16  ;;  %v500_v5 = vrot.slane %v498_v60, 1  ;;  %v973_v32 = vshll.u32 %v1807_v20, 16  ;;  %v1809_v35 = vld [vmem:[%s1979_s30 + $0xc0] sm:$0xff]  }
  0x47   : > { %1016 = vrot.lane.b32.xlu1 %v945_v42, %s1896_s6  ;;  %v856_v42 = vor.u32 %v855_v23, %v851_v22  ;;  %v597_v21 = vsel %vm417_vm0, %v592_v6, %v596_v4  ;;  %v1815_v37 = vld [vmem:[%s2451_s1] sm:$0xff]   ;;  %v971_v43 = vshrl.u32 %v1807_v20, 16  ;;  %v875_v49 = vshrl.u32 %v1808_v24, 16 }
  0x48   : > { %1000 = vrot.lane.b32.xlu0 %v849_v46, %s1896_s6  ;;  %v968_v46 = vrot.slane %v966_v29, 1  ;;  %v608_v23 = vrot.slane %v606_v10, 1  ;;  %1655 = vmatprep.subr.bf16.mxu0 %v1815_v37  ;;  %v975_v44 = vrot.slane %v973_v32, 1  ;;  %v889_v51 = vshll.u32 %v1810_v40, 16 }
  0x49   : > { %1689 = vmatprep.subr.bf16.mxu1 %v1815_v37  ;;  %1656 = vmatpush3.bf16.msra.mxu0 %v1815_v37 }
  0x4a   : > { %v969_v2 = vsel %vm417_vm0, %v964_v48, %v968_v46  ;;  %v985_v46 = vshll.u32 %v1809_v35, 16  ;;  %v1813_v48 = vld [vmem:[%s1979_s30 + $0xc8] ss:$0 sps:$4 sm:$0x11]   ;;  %1690 = vmatpush3.bf16.msra.mxu1 %v1815_v37 }
  0x4b   : > { %634 = vrot.lane.b32.xlu1 %v573_v57, %s1895_s5  ;;  %v861_v57 = vsel %vm417_vm0, %v856_v42, %v860_v38  ;;  %v877_v38 = vshll.u32 %v1808_v24, 16  ;;  %v1812_v42 = vld [vmem:[%s1979_s30 + $0x5c] ss:$0 sps:$4 sm:$0x11]  }
  0x4c   : > { %618 = vrot.lane.b32.xlu0 %v477_v0, %s1895_s5  ;;  %v1806_v0 = vld [vmem:[%s1979_s30 + $0x5c] ss:$0 sps:$4 sm:$0x11]   ;;  %v882_v52 = vshll.u32 %v1812_v42, 16  ;;  %v987_v60 = vrot.slane %v985_v46, 1 }
  0x4d   : > { %v510_v18 = vshll.u32 %v1806_v0, 16  ;;  %v879_v50 = vrot.slane %v877_v38, 1  ;;  %v887_v0 = vshrl.u32 %v1810_v40, 16 }
  0x4f   : > { %636 = vrot.lane.b32.xlu1 %v585_v9, %s1895_s5  ;;  %v603_v9 = vrot.slane %v601_v55, 1  ;;  %v512_v29 = vrot.slane %v510_v18, 1  ;;  %v976_v55 = vor.u32 %v975_v44, %v971_v43 }
  0x50   : > { %620 = vrot.lane.b32.xlu0 %v489_v14, %s1895_s5  ;;  %v873_v14 = vsel %vm417_vm0, %v868_v61, %v872_v59  ;;  %v983_v59 = vshrl.u32 %v1809_v35, 16  ;;  %v990_v61 = vshll.u32 %v1813_v48, 16 }
  0x52   : > { %v988_v6 = vor.u32 %v987_v60, %v983_v59 }
  0x53   : > { %746 = vrot.lane.b32.xlu1 %v1791_v56, %s1894_s4  ;;  %v2161_v56 = vld [vmem:[%s1979_s30 + $0x54] sm:$0xff]  }
  0x54   : > { %730 = vrot.lane.b32.xlu0 %v1792_v62, %s1894_s4  ;;  %v491_v62 = vshrl.u32 %v2145_v34, 16  ;;  %v505_v1 = vshll.u32 %v2161_v56, 16  ;;  %v503_v8 = vshrl.u32 %v2161_v56, 16 }
  0x56   : > { %v507_v16 = vrot.slane %v505_v1, 1  ;;  %v891_v1 = vrot.slane %v889_v51, 1 }
  0x57   : > { %748 = vrot.lane.b32.xlu1 %v1793_v63, %s1894_s4  ;;  %v495_v63 = vrot.slane %v493_v47, 1  ;;  %v978_v47 = vshll.u32 %v1811_v36, 16 }
  0x58   : > { %732 = vrot.lane.b32.xlu0 %v1794_v3, %s1894_s4  ;;  %v599_v3 = vshrl.u32 %v2150_v41, 16  ;;  %v508_v27 = vor.u32 %v507_v16, %v503_v8  ;;  %v892_v10 = vor.u32 %v891_v1, %v887_v0 }
  0x59   : > { %v496_v15 = vor.u32 %v495_v63, %v491_v62  ;;  %v880_v62 = vor.u32 %v879_v50, %v875_v49  ;;  %v884_v63 = vrot.slane %v882_v52, 1 }
  0x5a   : > { %v604_v22 = vor.u32 %v603_v9, %v599_v3  ;;  %v513_v39 = vsel %vm417_vm0, %v508_v27, %v512_v29  ;;  %v992_v3 = vrot.slane %v990_v61, 1 }
  0x5b   : > { %1018 = vrot.lane.b32.xlu1 %v957_v54, %s1896_s6  ;;  %v501_v25 = vsel %vm417_vm0, %v496_v15, %v500_v5  ;;  %v1814_v54 = vld [vmem:[%s1979_s30 + $0x68] ss:$0 sps:$4 sm:$0x11]   ;;  %v885_v9 = vsel %vm417_vm0, %v880_v62, %v884_v63  ;;  %s1897_s30 = smov [#allocation2]  }
  0x5c   : > { %1002 = vrot.lane.b32.xlu0 %v861_v57, %s1896_s6  ;;  %v609_v33 = vsel %vm417_vm0, %v604_v22, %v608_v23  ;;  %v980_v57 = vrot.slane %v978_v47, 1  ;;  %v993_v8 = vsel %vm417_vm0, %v988_v6, %v992_v3 }
  0x5e   : > { %v981_v4 = vsel %vm417_vm0, %v976_v55, %v980_v57 }
  0x5f   : > { %1020 = vrot.lane.b32.xlu1 %v969_v2, %s1896_s6  ;;  %v894_v2 = vshll.u32 %v1814_v54, 16 }
  0x60   : > { %1004 = vrot.lane.b32.xlu0 %v873_v14, %s1896_s6 }
  0x61   : > { %v896_v5 = vrot.slane %v894_v2, 1 }
  0x63   : > { %638 = vrot.lane.b32.xlu1 %v597_v21, %s1895_s5  ;;  %v897_v14 = vsel %vm417_vm0, %v892_v10, %v896_v5 }
  0x64   : > { %622 = vrot.lane.b32.xlu0 %v501_v25, %s1895_s5 }
  0x67   : > { %640 = vrot.lane.b32.xlu1 %v609_v33, %s1895_s5 }
  0x68   : > { %624 = vrot.lane.b32.xlu0 %v513_v39, %s1895_s5  ;;  %s1820_s5 = sshll.u32 %s1897_s30, 4  ;;  %s1821_s5 = int_to_ptr.vmem [resolvable:$false] %s1820_s5 }
  0x69   : > { %p1823_p1 = scmp.lt.s32.totalorder %s2398_s23, %s1821_s5 }
  0x6b   : > { %750 = vrot.lane.b32.xlu1 %v1807_v20, %s1894_s4 }
  0x6c   : > { %734 = vrot.lane.b32.xlu0 %v1808_v24, %s1894_s4 }
  0x6f   : > { %752 = vrot.lane.b32.xlu1 %v1809_v35, %s1894_s4 }
  0x70   : > { %736 = vrot.lane.b32.xlu0 %v1810_v40, %s1894_s4 }
  0x73   : > { %1022 = vrot.lane.b32.xlu1 %v981_v4, %s1896_s6 }
  0x74   : > { %1006 = vrot.lane.b32.xlu0 %v885_v9, %s1896_s6 }
  0x77   : > { %1024 = vrot.lane.b32.xlu1 %v993_v8, %s1896_s6 }
  0x78   : > { %1008 = vrot.lane.b32.xlu0 %v897_v14, %s1896_s6  ;;  %s1822_s6 = scalar_lea.vmem %s1821_s5, 8192 }
  0x79   : > { %p1824_p2 = scmp.lt.s32.totalorder %s1822_s6, %s1816_s29 }
  0x7b   : > { %p1825_p3 = por %p1824_p2, %p1823_p1 }
  0x7d   : > { %p1826_p5 = pnand %p1825_p3, %p1819_p0 }
  0x8c   : > { %v739_v15 = vpop.permute.xlu1 %738 }
  0x8d   : > { %v723_v16 = vpop.permute.xlu0 %722 }
  0x90   : > { %v741_v18 = vpop.permute.xlu1 %740 }
  0x91   : > { %v725_v20 = vpop.permute.xlu0 %724 }
  0x95   : > { %v613_v21 = vpop.permute.xlu1 %612 }
  0x96   : > { %v611_v22 = vpop.permute.xlu0 %610 }
  0x97   : > { %v1028_v25 = vsel %vm1026_vm1, %v2008_v13, %v611_v22  ;;  %v1030_v13 = vsel %vm1026_vm1, %v1997_v7, %v613_v21 }
  0x98   : > { %v1061_v37 = vsel %vm1059_vm3, %v1028_v25, %v723_v16 }
  0x99   : > { %v629_v23 = vpop.permute.xlu1 %628 }
  0x9a   : > { %v627_v24 = vpop.permute.xlu0 %626  ;;  %v1046_v33 = vsel %vm1026_vm1, %v2014_v19, %v629_v23  ;;  %v1063_v19 = vsel %vm1059_vm3, %v1030_v13, %v725_v20 }
  0x9b   : > { %v1044_v27 = vsel %vm1026_vm1, %v2020_v26, %v627_v24  ;;  %v1079_v38 = vsel %vm1059_vm3, %v1046_v33, %v741_v18 }
  0x9c   : > { %v1077_v32 = vsel %vm1059_vm3, %v1044_v27, %v739_v15 }
  0x9d   : > { %v1011_v29 = vpop.permute.xlu1 %1010 }
  0x9e   : > { %v1110_v35 = vsel %vm1092_vm2, %v1077_v32, %v1011_v29  ;;  %v995_v36 = vpop.permute.xlu0 %994 }
  0x9f   : > { %1673 = vmatprep.mubr.msk.bf16.mxu1 %vm1140_vm4, %v1110_v35  ;;  %v1094_v26 = vsel %vm1092_vm2, %v1061_v37, %v995_v36 }
  0xa0   : > { %1657 = vmatprep.mubr.msk.bf16.mxu0 %vm1140_vm4, %v1094_v26 }
  0xa1   : > { %v1013_v39 = vpop.permute.xlu1 %1012 }
  0xa2   : > { %v1112_v40 = vsel %vm1092_vm2, %v1079_v38, %v1013_v39  ;;  %v997_v42 = vpop.permute.xlu0 %996 }
  0xa3   : > { %1674 = vmatmul.mubr.msk.bf16.vlgmr.msra.gmra.mxu1 %vm1140_vm4, %v1112_v40  ;;  %v1096_v43 = vsel %vm1092_vm2, %v1063_v19, %v997_v42 }
  0xa4   : > { %1658 = vmatmul.mubr.msk.bf16.vlgmr.msra.gmra.mxu0 %vm1140_vm4, %v1096_v43 }
  0xa5   : > { %v631_v44 = vpop.permute.xlu1 %630 }
  0xa6   : > { %v615_v7 = vpop.permute.xlu0 %614  ;;  %v1048_v52 = vsel %vm1026_vm1, %v2036_v53, %v631_v44 }
  0xa7   : > { %v1032_v57 = vsel %vm1026_vm1, %v2040_v58, %v615_v7 }
  0xa9   : > { %v633_v46 = vpop.permute.xlu1 %632 }
  0xaa   : > { %v617_v47 = vpop.permute.xlu0 %616  ;;  %v1050_v62 = vsel %vm1026_vm1, %v2050_v11, %v633_v46 }
  0xab   : > { %v1034_v58 = vsel %vm1026_vm1, %v2066_v30, %v617_v47 }
  0xad   : > { %v743_v48 = vpop.permute.xlu1 %742 }
  0xae   : > { %v727_v49 = vpop.permute.xlu0 %726  ;;  %v1081_v54 = vsel %vm1059_vm3, %v1048_v52, %v743_v48 }
  0xaf   : > { %v1065_v60 = vsel %vm1059_vm3, %v1032_v57, %v727_v49 }
  0xb1   : > { %v745_v50 = vpop.permute.xlu1 %744 }
  0xb2   : > { %v729_v51 = vpop.permute.xlu0 %728  ;;  %v1083_v53 = vsel %vm1059_vm3, %v1050_v62, %v745_v50 }
  0xb3   : > { %v1067_v2 = vsel %vm1059_vm3, %v1034_v58, %v729_v51 }
  0xb5   : > { %v1015_v55 = vpop.permute.xlu1 %1014 }
  0xb6   : > { %v1114_v59 = vsel %vm1092_vm2, %v1081_v54, %v1015_v55  ;;  %v999_v61 = vpop.permute.xlu0 %998 }
  0xb7   : > { %1677 = vmatprep.mubr.msk.bf16.mxu1 %vm1140_vm4, %v1114_v59  ;;  %v1098_v63 = vsel %vm1092_vm2, %v1065_v60, %v999_v61 }
  0xb8   : > { %1661 = vmatprep.mubr.msk.bf16.mxu0 %vm1140_vm4, %v1098_v63 }
  0xb9   : > { %v1017_v0 = vpop.permute.xlu1 %1016 }
  0xba   : > { %v1116_v1 = vsel %vm1092_vm2, %v1083_v53, %v1017_v0  ;;  %v1001_v4 = vpop.permute.xlu0 %1000 }
  0xbb   : > { %1678 = vmatmul.mubr.msk.bf16.gmra.mxu1 %vm1140_vm4, %v1116_v1  ;;  %v1100_v6 = vsel %vm1092_vm2, %v1067_v2, %v1001_v4 }
  0xbc   : > { %1662 = vmatmul.mubr.msk.bf16.gmra.mxu0 %vm1140_vm4, %v1100_v6 }
  0xbd   : > { %v635_v11 = vpop.permute.xlu1 %634 }
  0xbe   : > { %v619_v3 = vpop.permute.xlu0 %618  ;;  %v1052_v30 = vsel %vm1026_vm1, %v2090_v12, %v635_v11 }
  0xbf   : > { %v1036_v20 = vsel %vm1026_vm1, %v2094_v17, %v619_v3 }
  0xc1   : > { %v637_v9 = vpop.permute.xlu1 %636 }
  0xc2   : > { %v621_v10 = vpop.permute.xlu0 %620  ;;  %v1054_v24 = vsel %vm1026_vm1, %v2103_v31, %v637_v9 }
  0xc3   : > { %v1038_v17 = vsel %vm1026_vm1, %v2115_v45, %v621_v10 }
  0xc5   : > { %v747_v5 = vpop.permute.xlu1 %746 }
  0xc6   : > { %v731_v8 = vpop.permute.xlu0 %730  ;;  %v1085_v16 = vsel %vm1059_vm3, %v1052_v30, %v747_v5 }
  0xc7   : > { %v1069_v22 = vsel %vm1059_vm3, %v1036_v20, %v731_v8 }
  0xc9   : > { %v749_v14 = vpop.permute.xlu1 %748 }
  0xca   : > { %v733_v15 = vpop.permute.xlu0 %732  ;;  %v1087_v12 = vsel %vm1059_vm3, %v1054_v24, %v749_v14 }
  0xcb   : > { %v1071_v32 = vsel %vm1059_vm3, %v1038_v17, %v733_v15 }
  0xcd   : > { %v1019_v18 = vpop.permute.xlu1 %1018 }
  0xce   : > { %v1118_v21 = vsel %vm1092_vm2, %v1085_v16, %v1019_v18  ;;  %v1003_v23 = vpop.permute.xlu0 %1002 }
  0xcf   : > { %1681 = vmatprep.mubr.msk.bf16.mxu1 %vm1140_vm4, %v1118_v21  ;;  %v1102_v25 = vsel %vm1092_vm2, %v1069_v22, %v1003_v23 }
  0xd0   : > { %1665 = vmatprep.mubr.msk.bf16.mxu0 %vm1140_vm4, %v1102_v25 }
  0xd1   : > { %v1021_v27 = vpop.permute.xlu1 %1020 }
  0xd2   : > { %v1120_v29 = vsel %vm1092_vm2, %v1087_v12, %v1021_v27  ;;  %v1005_v33 = vpop.permute.xlu0 %1004 }
  0xd3   : > { %1682 = vmatmul.mubr.msk.bf16.gmra.mxu1 %vm1140_vm4, %v1120_v29  ;;  %v1104_v35 = vsel %vm1092_vm2, %v1071_v32, %v1005_v33 }
  0xd4   : > { %1666 = vmatmul.mubr.msk.bf16.gmra.mxu0 %vm1140_vm4, %v1104_v35 }
  0xd5   : > { %v639_v31 = vpop.permute.xlu1 %638 }
  0xd6   : > { %v623_v36 = vpop.permute.xlu0 %622  ;;  %v1056_v45 = vsel %vm1026_vm1, %v2139_v28, %v639_v31 }
  0xd7   : > { %v1040_v43 = vsel %vm1026_vm1, %v2145_v34, %v623_v36 }
  0xd9   : > { %v641_v37 = vpop.permute.xlu1 %640 }
  0xda   : > { %v625_v13 = vpop.permute.xlu0 %624  ;;  %v1058_v47 = vsel %vm1026_vm1, %v2150_v41, %v641_v37  ;;  %v2291_v41 = vld [vmem:[%s2452_s2] ss:$0 sm:$0xff] }
  0xdb   : > { %v1042_v34 = vsel %vm1026_vm1, %v2161_v56, %v625_v13 }
  0xdd   : > { %v751_v26 = vpop.permute.xlu1 %750 }
  0xde   : > { %v735_v38 = vpop.permute.xlu0 %734  ;;  %v1089_v19 = vsel %vm1059_vm3, %v1056_v45, %v751_v26 }
  0xdf   : > { %v1073_v7 = vsel %vm1059_vm3, %v1040_v43, %v735_v38 }
  0xe1   : > { %v753_v39 = vpop.permute.xlu1 %752 }
  0xe2   : > { %v737_v40 = vpop.permute.xlu0 %736  ;;  %v1091_v48 = vsel %vm1059_vm3, %v1058_v47, %v753_v39 }
  0xe3   : > { %v1075_v51 = vsel %vm1059_vm3, %v1042_v34, %v737_v40 }
  0xe5   : > { %v1023_v42 = vpop.permute.xlu1 %1022 }
  0xe6   : > { %v1122_v44 = vsel %vm1092_vm2, %v1089_v19, %v1023_v42  ;;  %v1007_v46 = vpop.permute.xlu0 %1006 }
  0xe7   : > { %1685 = vmatprep.mubr.msk.bf16.mxu1 %vm1140_vm4, %v1122_v44  ;;  %v1106_v28 = vsel %vm1092_vm2, %v1073_v7, %v1007_v46 }
  0xe8   : > { %1669 = vmatprep.mubr.msk.bf16.mxu0 %vm1140_vm4, %v1106_v28 }
  0xe9   : > { %v1025_v49 = vpop.permute.xlu1 %1024 }
  0xea   : > { %v1124_v50 = vsel %vm1092_vm2, %v1091_v48, %v1025_v49  ;;  %v1009_v52 = vpop.permute.xlu0 %1008 }
  0xeb   : > { %1686 = vmatmul.mubr.msk.bf16.gmra.mxu1 %vm1140_vm4, %v1124_v50  ;;  %v1108_v54 = vsel %vm1092_vm2, %v1075_v51, %v1009_v52 }
  0xec   : > { %1670 = vmatmul.mubr.msk.bf16.gmra.mxu0 %vm1140_vm4, %v1108_v54 }
 0x163   : > { %v1675_v56 = vpop.f32.mrf.mxu1 }
 0x164   : > { %v1280_v55 = vadd.f32 %v1675_v56, %v2291_v41  ;;  %v1659_v57 = vpop.f32.mrf.mxu0 }
 0x165   : > { %v1271_v59 = vpop.f32.mrf.mxu1  ;;  %v1216_v60 = vadd.f32 %v1659_v57, %v2291_v41 }
 0x166   : > { %v1352_v61 = vmax.f32 %v1280_v55, 0.0  ;;  %v1272_v62 = vadd.f32 %v2291_v41, %v1271_v59  ;;  %v1207_v63 = vpop.f32.mrf.mxu0 }
 0x167   : > { %v1676_v53 = vpop.f32.mrf.mxu1  ;;  %v1336_v0 = vmax.f32 %v1216_v60, 0.0  ;;  %v1208_v58 = vadd.f32 %v2291_v41, %v1207_v63 }
 0x168   : > { %1385 = vst.msk [vmem:[%s2298_s19 + $0x90] sm:$0xff] %vm1366_vm5, %v1352_v61  ;;  %v1350_v1 = vmax.f32 %v1272_v62, 0.0  ;;  %v1283_v2 = vadd.f32 %v1676_v53, %v2291_v41  ;;  %v1660_v4 = vpop.f32.mrf.mxu0 }
 0x169   : > { %v1274_v6 = vpop.f32.mrf.mxu1  ;;  %1369 = vst.msk [vmem:[%s2298_s19 + $0x10] sm:$0xff] %vm1366_vm5, %v1336_v0  ;;  %v1334_v11 = vmax.f32 %v1208_v58, 0.0  ;;  %v1219_v3 = vadd.f32 %v1660_v4, %v2291_v41 }
 0x16a   : > { %1383 = vst.msk [vmem:[%s2298_s19 + $0x80] sm:$0xff] %vm1366_vm5, %v1350_v1  ;;  %v1353_v9 = vmax.f32 %v1283_v2, 0.0  ;;  %v1275_v10 = vadd.f32 %v2291_v41, %v1274_v6  ;;  %v1210_v5 = vpop.f32.mrf.mxu0 }
 0x16b   : > { %1367 = vst.msk [vmem:[%s2298_s19] sm:$0xff] %vm1366_vm5, %v1334_v11  ;;  %v1337_v8 = vmax.f32 %v1219_v3, 0.0  ;;  %v1211_v14 = vadd.f32 %v2291_v41, %v1210_v5 }
 0x16c   : > { %1386 = vst.msk [vmem:[%s2298_s19 + $0x98] sm:$0xff] %vm1366_vm5, %v1353_v9  ;;  %v1351_v15 = vmax.f32 %v1275_v10, 0.0 }
 0x16d   : > { %1370 = vst.msk [vmem:[%s2298_s19 + $0x18] sm:$0xff] %vm1366_vm5, %v1337_v8  ;;  %v1335_v30 = vmax.f32 %v1211_v14, 0.0 }
 0x16e   : > { %1384 = vst.msk [vmem:[%s2298_s19 + $0x88] sm:$0xff] %vm1366_vm5, %v1351_v15 }
 0x16f   : > { %1368 = vst.msk [vmem:[%s2298_s19 + $0x8] sm:$0xff] %vm1366_vm5, %v1335_v30 }
 0x17b   : > { %v1679_v16 = vpop.f32.mrf.mxu1 }
 0x17c   : > { %v1296_v18 = vadd.f32 %v1679_v16, %v2291_v41  ;;  %v1663_v20 = vpop.f32.mrf.mxu0 }
 0x17d   : > { %v1287_v21 = vpop.f32.mrf.mxu1  ;;  %v1232_v22 = vadd.f32 %v1663_v20, %v2291_v41 }
 0x17e   : > { %v1356_v23 = vmax.f32 %v1296_v18, 0.0  ;;  %v1288_v24 = vadd.f32 %v2291_v41, %v1287_v21  ;;  %v1223_v25 = vpop.f32.mrf.mxu0 }
 0x17f   : > { %v1680_v12 = vpop.f32.mrf.mxu1  ;;  %v1340_v27 = vmax.f32 %v1232_v22, 0.0  ;;  %v1224_v17 = vadd.f32 %v2291_v41, %v1223_v25 }
 0x180   : > { %1389 = vst.msk [vmem:[%s2298_s19 + $0xb0] sm:$0xff] %vm1366_vm5, %v1356_v23  ;;  %v1354_v29 = vmax.f32 %v1288_v24, 0.0  ;;  %v1299_v32 = vadd.f32 %v1680_v12, %v2291_v41  ;;  %v1664_v33 = vpop.f32.mrf.mxu0 }
 0x181   : > { %v1290_v35 = vpop.f32.mrf.mxu1  ;;  %1373 = vst.msk [vmem:[%s2298_s19 + $0x30] sm:$0xff] %vm1366_vm5, %v1340_v27  ;;  %v1338_v31 = vmax.f32 %v1224_v17, 0.0  ;;  %v1235_v36 = vadd.f32 %v1664_v33, %v2291_v41 }
 0x182   : > { %1387 = vst.msk [vmem:[%s2298_s19 + $0xa0] sm:$0xff] %vm1366_vm5, %v1354_v29  ;;  %v1357_v37 = vmax.f32 %v1299_v32, 0.0  ;;  %v1291_v13 = vadd.f32 %v2291_v41, %v1290_v35  ;;  %v1226_v26 = vpop.f32.mrf.mxu0 }
 0x183   : > { %1371 = vst.msk [vmem:[%s2298_s19 + $0x20] sm:$0xff] %vm1366_vm5, %v1338_v31  ;;  %v1341_v38 = vmax.f32 %v1235_v36, 0.0  ;;  %v1227_v39 = vadd.f32 %v2291_v41, %v1226_v26 }
 0x184   : > { %1390 = vst.msk [vmem:[%s2298_s19 + $0xb8] sm:$0xff] %vm1366_vm5, %v1357_v37  ;;  %v1355_v40 = vmax.f32 %v1291_v13, 0.0 }
 0x185   : > { %1374 = vst.msk [vmem:[%s2298_s19 + $0x38] sm:$0xff] %vm1366_vm5, %v1341_v38  ;;  %v1339_v45 = vmax.f32 %v1227_v39, 0.0 }
 0x186   : > { %1388 = vst.msk [vmem:[%s2298_s19 + $0xa8] sm:$0xff] %vm1366_vm5, %v1355_v40 }
 0x187   : > { %1372 = vst.msk [vmem:[%s2298_s19 + $0x28] sm:$0xff] %vm1366_vm5, %v1339_v45 }
 0x193   : > { %v1683_v19 = vpop.f32.mrf.mxu1 }
 0x194   : > { %v1312_v42 = vadd.f32 %v1683_v19, %v2291_v41  ;;  %v1667_v43 = vpop.f32.mrf.mxu0 }
 0x195   : > { %v1303_v44 = vpop.f32.mrf.mxu1  ;;  %v1248_v7 = vadd.f32 %v1667_v43, %v2291_v41 }
 0x196   : > { %v1360_v46 = vmax.f32 %v1312_v42, 0.0  ;;  %v1304_v47 = vadd.f32 %v2291_v41, %v1303_v44  ;;  %v1239_v28 = vpop.f32.mrf.mxu0 }
 0x197   : > { %v1684_v48 = vpop.f32.mrf.mxu1  ;;  %v1344_v49 = vmax.f32 %v1248_v7, 0.0  ;;  %v1240_v34 = vadd.f32 %v2291_v41, %v1239_v28 }
 0x198   : > { %1393 = vst.msk [vmem:[%s2298_s19 + $0xd0] sm:$0xff] %vm1366_vm5, %v1360_v46  ;;  %v1358_v50 = vmax.f32 %v1304_v47, 0.0  ;;  %v1315_v51 = vadd.f32 %v1684_v48, %v2291_v41  ;;  %v1668_v52 = vpop.f32.mrf.mxu0 }
 0x199   : > { %v1306_v54 = vpop.f32.mrf.mxu1  ;;  %1377 = vst.msk [vmem:[%s2298_s19 + $0x50] sm:$0xff] %vm1366_vm5, %v1344_v49  ;;  %v1342_v56 = vmax.f32 %v1240_v34, 0.0  ;;  %v1251_v55 = vadd.f32 %v1668_v52, %v2291_v41 }
 0x19a   : > { %1391 = vst.msk [vmem:[%s2298_s19 + $0xc0] sm:$0xff] %vm1366_vm5, %v1358_v50  ;;  %v1361_v57 = vmax.f32 %v1315_v51, 0.0  ;;  %v1307_v59 = vadd.f32 %v2291_v41, %v1306_v54  ;;  %v1242_v60 = vpop.f32.mrf.mxu0 }
 0x19b   : > { %1375 = vst.msk [vmem:[%s2298_s19 + $0x40] sm:$0xff] %vm1366_vm5, %v1342_v56  ;;  %v1345_v61 = vmax.f32 %v1251_v55, 0.0  ;;  %v1243_v62 = vadd.f32 %v2291_v41, %v1242_v60 }
 0x19c   : > { %1394 = vst.msk [vmem:[%s2298_s19 + $0xd8] sm:$0xff] %vm1366_vm5, %v1361_v57  ;;  %v1359_v63 = vmax.f32 %v1307_v59, 0.0 }
 0x19d   : > { %1378 = vst.msk [vmem:[%s2298_s19 + $0x58] sm:$0xff] %vm1366_vm5, %v1345_v61  ;;  %v1343_v53 = vmax.f32 %v1243_v62, 0.0 }
 0x19e   : > { %1392 = vst.msk [vmem:[%s2298_s19 + $0xc8] sm:$0xff] %vm1366_vm5, %v1359_v63 }
 0x19f   : > { %1376 = vst.msk [vmem:[%s2298_s19 + $0x48] sm:$0xff] %vm1366_vm5, %v1343_v53 }
 0x1ab   : > { %v1687_v0 = vpop.f32.mrf.mxu1 }
 0x1ac   : > { %v1328_v58 = vadd.f32 %v1687_v0, %v2291_v41  ;;  %v1671_v1 = vpop.f32.mrf.mxu0 }
 0x1ad   : > { %v1319_v2 = vpop.f32.mrf.mxu1  ;;  %v1264_v4 = vadd.f32 %v1671_v1, %v2291_v41 }
 0x1ae   : > { %v1364_v6 = vmax.f32 %v1328_v58, 0.0  ;;  %v1320_v11 = vadd.f32 %v2291_v41, %v1319_v2  ;;  %v1255_v3 = vpop.f32.mrf.mxu0 }
 0x1af   : > { %v1688_v9 = vpop.f32.mrf.mxu1  ;;  %v1348_v10 = vmax.f32 %v1264_v4, 0.0  ;;  %v1256_v5 = vadd.f32 %v2291_v41, %v1255_v3 }
 0x1b0   : > { %1397 = vst.msk [vmem:[%s2298_s19 + $0xf0] sm:$0xff] %vm1366_vm5, %v1364_v6  ;;  %v1362_v8 = vmax.f32 %v1320_v11, 0.0  ;;  %v1331_v14 = vadd.f32 %v1688_v9, %v2291_v41  ;;  %v1672_v15 = vpop.f32.mrf.mxu0 }
 0x1b1   : > { %v1322_v30 = vpop.f32.mrf.mxu1  ;;  %1381 = vst.msk [vmem:[%s2298_s19 + $0x70] sm:$0xff] %vm1366_vm5, %v1348_v10  ;;  %v1346_v16 = vmax.f32 %v1256_v5, 0.0  ;;  %v1267_v18 = vadd.f32 %v1672_v15, %v2291_v41 }
 0x1b2   : > { %1395 = vst.msk [vmem:[%s2298_s19 + $0xe0] sm:$0xff] %vm1366_vm5, %v1362_v8  ;;  %v1365_v20 = vmax.f32 %v1331_v14, 0.0  ;;  %v1323_v21 = vadd.f32 %v2291_v41, %v1322_v30  ;;  %v1258_v22 = vpop.f32.mrf.mxu0 }
 0x1b3   : > { %1379 = vst.msk [vmem:[%s2298_s19 + $0x60] sm:$0xff] %vm1366_vm5, %v1346_v16  ;;  %v1349_v23 = vmax.f32 %v1267_v18, 0.0  ;;  %v1259_v24 = vadd.f32 %v2291_v41, %v1258_v22 }
 0x1b4   : > { %1398 = vst.msk [vmem:[%s2298_s19 + $0xf8] sm:$0xff] %vm1366_vm5, %v1365_v20  ;;  %v1363_v25 = vmax.f32 %v1323_v21, 0.0 }
 0x1b5   : > { %1382 = vst.msk [vmem:[%s2298_s19 + $0x78] sm:$0xff] %vm1366_vm5, %v1349_v23  ;;  %v1347_v12 = vmax.f32 %v1259_v24, 0.0 }
 0x1b6   : > { %1396 = vst.msk [vmem:[%s2298_s19 + $0xe8] sm:$0xff] %vm1366_vm5, %v1363_v25 }
 0x1b7   : > { %1380 = vst.msk [vmem:[%s2298_s19 + $0x68] sm:$0xff] %vm1366_vm5, %v1347_v12 }
 0x1b8   : > { %1829 = shalt.err (!%p1826_p5)
}
 0x1b9   : > { %s1830_s7 = scalar_lea.hbm %s2392_s28, 4096  ;;  %s1834_s10 = scalar_lea.hbm %s2453_s3, 8192 }
 0x1ba   : > { %p1831_p6 = scmp.ne.s32.totalorder %s2392_s28, %s1830_s7  ;;  %p1835_p10 = scmp.lt.s32.totalorder %s2392_s28, %s2453_s3 }
 0x1bb   : > { %p1836_p11 = scmp.lt.s32.totalorder %s1834_s10, %s1830_s7 }
 0x1bc   : > { %p1832_p7 = pnand %p1831_p6, %p1959_p4 }
 0x1bd   : > { %p1837_p12 = por %p1836_p11, %p1835_p10 }
 0x1be   : > { %p1833_p9 = pneg %p1832_p7 }
 0x1c0   : > { %p1838_p13 = pnand %p1837_p12, %p1833_p9 }
 0x1c2   : > { %1841 = shalt.err (!%p1838_p13)
}
 0x1c3   : > { %s1898_s19 = smov 128  }
 0x1c4   : > { %1692 = dma.vmem_to_hbm [thread:$0]  (%p1959_p4), %s2398_s23, 4096, %s2392_s28, %s2404_s15, %s1898_s19, %s1898_s19, %s1894_s4  }
 0x1c5 PF: > { %p1698_p0 = scmp.ge.s32.totalorder %s1892_s17, 2  ;;  %s1431_s21 = sand.u32 1, %s1872_s12  }
 0x1c6   : > { %s1432_s26 = scalar_lea.sflag [#allocation3], %s1431_s21 }
 0x1c7   : > { %p1695_p1 = pnand %p1698_p0, %p1966_p8 }
 0x1c9   : > { %p1696_p2 = pneg %p1695_p1 }
 0x1cb   : > { %1867 = dma.done.wait (%p1696_p2), %s1432_s26, 4096  }
 0x1cc   : > { %1869 = vsyncadd (%p1696_p2), %s1432_s26, 4294963200  ;;  %s16_s17 = sadd.s32 1, %s1892_s17   ;;  %s2456_s12 = smov %s1876_s13 }
 0x1cd   : > { %p13_p3 = scmp.ge.s32.totalorder %s16_s17, 4   ;;  %s2457_s13 = smov %s1880_s14 }
 0x1ce   : > { %s2458_s14 = smov %s1972_s25  ;;  %s2459_s15 = smov %s1888_s16 }
 0x1cf   : > { %s2460_s16 = smov %s2462_s20  ;;  %15 = sbr.rel (!%p13_p3) target bundleno = 4 (0x4), region = 69 }
 0x1d4   :  { %1437 = vsyncpa [#allocation3], 1 }
 0x1d5   :  { %1439 = vsyncpa [#allocation3 + $0x1], 1 }

</bundles_post_ra>
